<compile_context>
chip_gen: v7x
topology: tpu7x:2x2x1
jax: 0.10.0
libtpu: 0.0.40
codegen_flags: <defaults>
</compile_context>

<pallas_src>
import jax
import jax.numpy as jnp
from jax.experimental import pallas as pl
from jax.experimental.pallas import tpu as pltpu

D_IN = 180     # fc1 input features
D_OUT = 180    # fc4 output features
D_PAD = 256    # lane-dense padded feature width (multiple of 128)
H = 128        # hidden width (fc1 out == folded fc2*fc3 out == fc4 in)
TILE_B = 128   # batch rows per grid step


def mlp_kernel(x_ref, w1_ref, w23_ref, w4_ref, b_ref, o_ref):
    # x_ref: (TILE_B, 256) bf16   w1: (256,128) bf16   w23: (128,128) bf16
    # w4: (128,256) bf16          b_ref: (3,256) f32 packed biases
    x = x_ref[...]
    b1 = b_ref[0:1, :H]      # (1,128)
    b23 = b_ref[1:2, :H]     # (1,128)
    b4 = b_ref[2:3, :]       # (1,256)

    # fc1 + relu  (MXU bf16 inputs, f32 accumulation; VPU math in f32)
    h = jnp.dot(x, w1_ref[...], preferred_element_type=jnp.float32) + b1
    h = jnp.maximum(h, 0.0)
    # folded fc2*fc3 + relu
    h = jnp.dot(h.astype(jnp.bfloat16), w23_ref[...],
                preferred_element_type=jnp.float32) + b23
    h = jnp.maximum(h, 0.0)
    # fc4
    out = jnp.dot(h.astype(jnp.bfloat16), w4_ref[...],
                  preferred_element_type=jnp.float32) + b4
    o_ref[...] = out.astype(o_ref.dtype)


def prepare_params(params):
    """Fold fc2/fc3, pad ragged dims to 256, pack biases, cast weights to bf16."""
    (w1, b1), (w2, b2), (w3, b3), (w4, b4) = params

    # Fold fc2 . fc3 (computed once, in f32): (h@w2+b2)@w3+b3 == h@(w2@w3) + (b2@w3+b3)
    w23 = w2 @ w3                       # (128, 128)
    b23 = b2 @ w3 + b3                  # (1, 128)

    # Zero-pad the 180-sized dims to 256 (input rows of w1, output cols of w4/b4).
    w1p = jnp.zeros((D_PAD, H), jnp.float32).at[:D_IN, :].set(w1)
    w4p = jnp.zeros((H, D_PAD), jnp.float32).at[:, :D_OUT].set(w4)
    b4p = jnp.zeros((1, D_PAD), jnp.float32).at[:, :D_OUT].set(b4)

    # Pack the biases into one (3, 256) f32 slab.
    biases = jnp.zeros((3, D_PAD), jnp.float32)
    biases = biases.at[0, :H].set(b1[0])
    biases = biases.at[1, :H].set(b23[0])
    biases = biases.at[2, :].set(b4p[0])

    return (w1p.astype(jnp.bfloat16),
            w23.astype(jnp.bfloat16),
            w4p.astype(jnp.bfloat16),
            biases)


def mlp_forward(x, prepared, tile_b=TILE_B):
    """x: (B, 180) f32 -> (B, 180) f32."""
    w1p, w23, w4p, biases = prepared
    B = x.shape[0]

    # Pad batch to a multiple of tile_b and features to 256; cast activations to bf16.
    bp = pl.cdiv(B, tile_b) * tile_b
    xp = jnp.zeros((bp, D_PAD), jnp.bfloat16).at[:B, :D_IN].set(
        x.astype(jnp.bfloat16))

    full = lambda i: (0, 0)  # weights/biases: same block every step -> VMEM resident
    out = pl.pallas_call(
        mlp_kernel,
        out_shape=jax.ShapeDtypeStruct((bp, D_PAD), jnp.float32),
        grid=(bp // tile_b,),
        in_specs=[
            pl.BlockSpec((tile_b, D_PAD), lambda i: (i, 0)),   # x tile (pipelined)
            pl.BlockSpec((D_PAD, H), full),                    # w1
            pl.BlockSpec((H, H), full),                        # w23 (folded fc2*fc3)
            pl.BlockSpec((H, D_PAD), full),                    # w4
            pl.BlockSpec((3, D_PAD), full),                    # packed biases
        ],
        out_specs=pl.BlockSpec((tile_b, D_PAD), lambda i: (i, 0)),
        compiler_params=pltpu.CompilerParams(
            dimension_semantics=("parallel",)),
    )(xp, w1p, w23, w4p, biases)

    return out[:B, :D_OUT]


def init_linear(key, fan_in, fan_out):
    # Matches PyTorch nn.Linear default init: U(-1/sqrt(fan_in), 1/sqrt(fan_in)).
    kw, kb = jax.random.split(key)
    bound = 1.0 / jnp.sqrt(float(fan_in))
    w = jax.random.uniform(kw, (fan_in, fan_out), jnp.float32, -bound, bound)  # (in, out)
    b = jax.random.uniform(kb, (1, fan_out), jnp.float32, -bound, bound)
    return w, b


if __name__ == "__main__":
    key = jax.random.PRNGKey(0)
    k_x, k1, k2, k3, k4 = jax.random.split(key, 5)

    B = 256  # multiple forward passes batched per call (amortizes weight DMA / launch)
    x = jax.random.normal(k_x, (B, D_IN), jnp.float32)

    params = (
        init_linear(k1, 180, 128),
        init_linear(k2, 128, 64),
        init_linear(k3, 64, 128),
        init_linear(k4, 128, 180),
    )
    prepared = prepare_params(params)

    out = mlp_forward(x, prepared)
    jax.block_until_ready(out)
    assert out.shape == (B, D_OUT)

    # --- Tight check: plain-JAX replica of the kernel's exact numerics (bf16 weights, fold) ---
    w1p, w23, w4p, biases = prepared
    xp = jnp.zeros((B, D_PAD), jnp.bfloat16).at[:, :D_IN].set(x.astype(jnp.bfloat16))
    h = jnp.maximum(jnp.dot(xp, w1p, preferred_element_type=jnp.float32)
                    + biases[0:1, :H], 0.0)
    h = jnp.maximum(jnp.dot(h.astype(jnp.bfloat16), w23,
                            preferred_element_type=jnp.float32) + biases[1:2, :H], 0.0)
    ref_tight = (jnp.dot(h.astype(jnp.bfloat16), w4p,
                         preferred_element_type=jnp.float32) + biases[2:3, :])[:, :D_OUT]
    assert jnp.allclose(out, ref_tight, atol=1e-4, rtol=1e-4)

    # --- Semantic check: exact f32 PyTorch-equivalent math (loose tol for bf16 weights) ---
    (w1, b1), (w2, b2), (w3, b3), (w4, b4) = params
    h = jnp.maximum(x @ w1 + b1, 0.0)
    h = h @ w2 + b2
    h = jnp.maximum(h @ w3 + b3, 0.0)
    ref_f32 = h @ w4 + b4
    assert jnp.allclose(out, ref_f32, atol=5e-2, rtol=5e-2)

    print("KERNEL_OK")
</pallas_src>

<mosaic_0001>
module attributes {stable_mosaic.version = 11 : i64} {
  func.func @mlp_kernel(%arg0: i32, %arg1: memref<128x256xbf16, #tpu.memory_space<vmem>>, %arg2: memref<256x128xbf16, #tpu.memory_space<vmem>>, %arg3: memref<128x128xbf16, #tpu.memory_space<vmem>>, %arg4: memref<128x256xbf16, #tpu.memory_space<vmem>>, %arg5: memref<3x256xf32, #tpu.memory_space<vmem>>, %arg6: memref<128x256xf32, #tpu.memory_space<vmem>>) attributes {dimension_semantics = [#tpu.dimension_semantics<parallel>], iteration_bounds = array<i64: 2>, scalar_prefetch = 0 : i64, scratch_operands = 0 : i64, tpu.core_type = #tpu.core_type<tc>, window_params = [{transform_indices = @transform_0, window_bounds = array<i64: 128, 256>}, {pipeline_mode = #tpu.pipeline_mode<synchronous>, transform_indices = @transform_1, window_bounds = array<i64: 256, 128>}, {pipeline_mode = #tpu.pipeline_mode<synchronous>, transform_indices = @transform_2, window_bounds = array<i64: 128, 128>}, {pipeline_mode = #tpu.pipeline_mode<synchronous>, transform_indices = @transform_3, window_bounds = array<i64: 128, 256>}, {pipeline_mode = #tpu.pipeline_mode<synchronous>, transform_indices = @transform_4, window_bounds = array<i64: 3, 256>}, {transform_indices = @transform_5, window_bounds = array<i64: 128, 256>}]} {
    %c0 = arith.constant 0 : index
    %c0_0 = arith.constant 0 : index
    %0 = vector.load %arg1[%c0, %c0_0] : memref<128x256xbf16, #tpu.memory_space<vmem>>, vector<128x256xbf16>
    %c0_1 = arith.constant 0 : index
    %c0_2 = arith.constant 0 : index
    %1 = vector.load %arg5[%c0_1, %c0_2] : memref<3x256xf32, #tpu.memory_space<vmem>>, vector<1x128xf32>
    %c1 = arith.constant 1 : index
    %c0_3 = arith.constant 0 : index
    %2 = vector.load %arg5[%c1, %c0_3] : memref<3x256xf32, #tpu.memory_space<vmem>>, vector<1x128xf32>
    %c2 = arith.constant 2 : index
    %c0_4 = arith.constant 0 : index
    %3 = vector.load %arg5[%c2, %c0_4] : memref<3x256xf32, #tpu.memory_space<vmem>>, vector<1x256xf32>
    %c0_5 = arith.constant 0 : index
    %c0_6 = arith.constant 0 : index
    %4 = vector.load %arg2[%c0_5, %c0_6] : memref<256x128xbf16, #tpu.memory_space<vmem>>, vector<256x128xbf16>
    %cst = arith.constant dense<0.000000e+00> : vector<128x128xf32>
    %5 = tpu.matmul %0, %4, %cst {dimension_numbers = #tpu.dot_dimension_numbers<[1], [0], [0], [1], [0, 0, 1, 1], [], []>} : vector<128x256xbf16>, vector<256x128xbf16>, vector<128x128xf32> -> vector<128x128xf32>
    %6 = vector.broadcast %1 : vector<1x128xf32> to vector<128x128xf32>
    %7 = arith.addf %5, %6 : vector<128x128xf32>
    %cst_7 = arith.constant 0.000000e+00 : f32
    %8 = vector.broadcast %cst_7 : f32 to vector<128x128xf32>
    %9 = arith.maximumf %7, %8 : vector<128x128xf32>
    %10 = arith.truncf %9 : vector<128x128xf32> to vector<128x128xbf16>
    %c0_8 = arith.constant 0 : index
    %c0_9 = arith.constant 0 : index
    %11 = vector.load %arg3[%c0_8, %c0_9] : memref<128x128xbf16, #tpu.memory_space<vmem>>, vector<128x128xbf16>
    %cst_10 = arith.constant dense<0.000000e+00> : vector<128x128xf32>
    %12 = tpu.matmul %10, %11, %cst_10 {dimension_numbers = #tpu.dot_dimension_numbers<[1], [0], [0], [1], [0, 0, 1, 1], [], []>} : vector<128x128xbf16>, vector<128x128xbf16>, vector<128x128xf32> -> vector<128x128xf32>
    %13 = vector.broadcast %2 : vector<1x128xf32> to vector<128x128xf32>
    %14 = arith.addf %12, %13 : vector<128x128xf32>
    %cst_11 = arith.constant 0.000000e+00 : f32
    %15 = vector.broadcast %cst_11 : f32 to vector<128x128xf32>
    %16 = arith.maximumf %14, %15 : vector<128x128xf32>
    %17 = arith.truncf %16 : vector<128x128xf32> to vector<128x128xbf16>
    %c0_12 = arith.constant 0 : index
    %c0_13 = arith.constant 0 : index
    %18 = vector.load %arg4[%c0_12, %c0_13] : memref<128x256xbf16, #tpu.memory_space<vmem>>, vector<128x256xbf16>
    %cst_14 = arith.constant dense<0.000000e+00> : vector<128x256xf32>
    %19 = tpu.matmul %17, %18, %cst_14 {dimension_numbers = #tpu.dot_dimension_numbers<[1], [0], [0], [1], [0, 0, 1, 1], [], []>} : vector<128x128xbf16>, vector<128x256xbf16>, vector<128x256xf32> -> vector<128x256xf32>
    %20 = vector.broadcast %3 : vector<1x256xf32> to vector<128x256xf32>
    %21 = arith.addf %19, %20 : vector<128x256xf32>
    %c0_15 = arith.constant 0 : index
    %c0_16 = arith.constant 0 : index
    %22 = vector.load %arg6[%c0_15, %c0_16] : memref<128x256xf32, #tpu.memory_space<vmem>>, vector<128x256xf32>
    tpu.vector_store %arg6[%c0_15, %c0_16], %21 {strides = array<i32>} : memref<128x256xf32, #tpu.memory_space<vmem>>, vector<128x256xf32>,
    return
  }
  func.func @transform_0(%arg0: i32) -> (i32, i32) {
    %c0_i32 = arith.constant 0 : i32
    %c0_i32_0 = arith.constant 0 : i32
    return %arg0, %c0_i32 : i32, i32
  }
  func.func @transform_1(%arg0: i32) -> (i32, i32) {
    %c0_i32 = arith.constant 0 : i32
    %c0_i32_0 = arith.constant 0 : i32
    %c0_i32_1 = arith.constant 0 : i32
    return %c0_i32, %c0_i32_0 : i32, i32
  }
  func.func @transform_2(%arg0: i32) -> (i32, i32) {
    %c0_i32 = arith.constant 0 : i32
    %c0_i32_0 = arith.constant 0 : i32
    %c0_i32_1 = arith.constant 0 : i32
    return %c0_i32, %c0_i32_0 : i32, i32
  }
  func.func @transform_3(%arg0: i32) -> (i32, i32) {
    %c0_i32 = arith.constant 0 : i32
    %c0_i32_0 = arith.constant 0 : i32
    %c0_i32_1 = arith.constant 0 : i32
    return %c0_i32, %c0_i32_0 : i32, i32
  }
  func.func @transform_4(%arg0: i32) -> (i32, i32) {
    %c0_i32 = arith.constant 0 : i32
    %c0_i32_0 = arith.constant 0 : i32
    %c0_i32_1 = arith.constant 0 : i32
    return %c0_i32, %c0_i32_0 : i32, i32
  }
  func.func @transform_5(%arg0: i32) -> (i32, i32) {
    %c0_i32 = arith.constant 0 : i32
    %c0_i32_0 = arith.constant 0 : i32
    return %arg0, %c0_i32 : i32, i32
  }
}

</mosaic_0001>

<bundles_post_ra>
// kernel: tpu_custom_call.1
= control target key start
LH: loop header
LB: loop body
LE: loop exit
PB: predicated region body
PF: predicated region fallthrough
CT: control target
= control target key end

     0   :  { %10 = vsyncpa [#allocation3], 0  ;;  %s2217_s0 = inlined_call_operand.hbm [shape: bf16[256,256], index: 0, kind: input, shape index: {}]   ;;  %s2218_s1 = inlined_call_operand.hbm [shape: bf16[256,128], index: 1, kind: input, shape index: {}]   ;;  %s2219_s2 = inlined_call_operand.hbm [shape: bf16[128,128], index: 2, kind: input, shape index: {}]   ;;  %s2220_s3 = inlined_call_operand.hbm [shape: bf16[128,256], index: 3, kind: input, shape index: {}]   ;;  %s2221_s4 = inlined_call_operand.vmem [shape: f32[3,256], index: 4, kind: input, shape index: {}]   ;;  %s2222_s5 = inlined_call_operand.hbm [shape: f32[256,256], index: 5, kind: output, shape index: {}]  }
   0x1   :  { %12 = vsyncpa [#allocation3 + $0x1], 0 }
   0x2   :  { %13 = vsyncpa [#allocation6], 0 }
   0x3   :  { %14 = vsyncpa [#allocation9], 0 }
   0x4   :  { %15 = vsyncpa [#allocation4], 0 }
   0x5   :  { %17 = vsyncpa [#allocation4 + $0x1], 0  ;;  %s1803_s18 = smov 0   ;;  %s1805_s19 = smov 0  }
   0x6   :  { %s1807_s20 = smov 0   ;;  %s1809_s21 = smov 0  }
   0x7 LB: > { %s1824_s22 = sadd.s32 4294967295, %s1759_s21   ;;  %s1202_s23 = sadd.s32 4294967294, %s1759_s21   ;;  %s1759_s21 = sphi %s1809_s21, %s2245_s21   ;;  %s1755_s20 = sphi %s1807_s20, %s2244_s20   ;;  %s1751_s19 = sphi %s1805_s19, %s2243_s19   ;;  %s1747_s18 = sphi %s1803_s18, %s2242_s18  }
   0x8   : > { %p43_p0 = scmp.ne.s32.totalorder %s1751_s19, %s1747_s18  ;;  %p2223_p1 = scmp.eq.s32.totalorder %s1824_s22, 0 }
   0x9   : > { %p157_p3 = scmp.eq.s32.totalorder %s1202_s23, 1  ;;  %p1203_p5 = scmp.ge.s32.totalorder %s1759_s21, 1 }
   0xa   : > { %p1833_p4 = por %p2223_p1, %p43_p0  ;;  %p164_p7 = scmp.lt.s32.totalorder %s1759_s21, 3 }
   0xb   : > { %p1838_p6 = por %p157_p3, %p43_p0  ;;  %s1761_s27 = smov [#allocation5]  }
   0xc   : > { %s2226_s24 = scalar_select %p1833_p4, 1, 0 }
   0xd   : > { %s2227_s25 = scalar_select %p1838_p6, 1, 0 }
   0xe   : > { %p1843_p8 = pnand %p1203_p5, %p164_p7  ;;  %s176_s28 = sshll.u32 %s1761_s27, 4  ;;  %s1847_s28 = int_to_ptr.vmem [resolvable:$true] %s176_s28 }
   0xf   : > { %s1762_s30 = smov [#allocation7]   ;;  %s1763_s7 = smov [#allocation8]  }
  0x10   : > { %s2228_s26 = scalar_select %p1843_p8, 1, 0 }
  0x11   : > { %p1431_p9 = pneg %p1843_p8  ;;  %s189_s6 = sshll.u32 %s1762_s30, 4  ;;  %s1858_s6 = int_to_ptr.vmem [resolvable:$true] %s189_s6 }
  0x12   : > { %s1860_s8 = sshll.u32 %s1763_s7, 4  ;;  %s1571_s11 = scalar_lea.hbm %s2218_s1, 2048  ;;  %s203_s8 = int_to_ptr.vmem [resolvable:$true] %s1860_s8 }
  0x13   : > { %p1854_p11 = pnand %p1431_p9, %p2223_p1  ;;  %p1572_p12 = scmp.ne.s32.totalorder %s2218_s1, %s1571_s11 }
  0x14   : > { %p1578_p5 = scmp.lt.u32.totalorder %s1571_s11, %s2218_s1 }
  0x15   : > { %p1870_p13 = pneg %p1854_p11 }
  0x17   : > { %p1574_p0 = pnand %p1870_p13, %p1572_p12 }
  0x19   : > { %p1575_p3 = pneg %p1574_p0 }
  0x1b   : > { %p1580_p7 = pnand %p1578_p5, %p1575_p3 }
  0x1d   : > { %1583 = shalt.err (!%p1580_p7)
}
  0x1e   : > { %s1584_s17 = scalar_lea.vmem %s1847_s28, 2048  ;;  %p1592_p2 = scmp.lt.s32.totalorder %s1847_s28, %s1847_s28 }
  0x1f   : > { %p1585_p9 = scmp.ne.s32.totalorder %s1847_s28, %s1584_s17  ;;  %p1593_p6 = scmp.lt.s32.totalorder %s1584_s17, %s1584_s17 }
  0x21   : > { %p1587_p10 = pnand %p1585_p9, %p1870_p13  ;;  %p1594_p12 = por %p1593_p6, %p1592_p2 }
  0x23   : > { %p1588_p1 = pneg %p1587_p10 }
  0x25   : > { %p1595_p0 = pnand %p1594_p12, %p1588_p1 }
  0x27   : > { %1598 = shalt.err (!%p1595_p0)
}
  0x28   : > { %s1764_s23 = smov 64   ;;  %s1765_s27 = smov 4  }
  0x29   : > { %1434 = dma.hbm_to_vmem [thread:$0]  (!%p1854_p11), %s2218_s1, 2048, %s1847_s28, [#allocation6], %s1764_s23, %s1764_s23, %s1765_s27  }
  0x2a   : > { %s1599_s11 = scalar_lea.hbm %s2219_s2, 1024 }
  0x2b   : > { %p1600_p2 = scmp.ne.s32.totalorder %s2219_s2, %s1599_s11  ;;  %p1606_p10 = scmp.lt.u32.totalorder %s1599_s11, %s2219_s2 }
  0x2d   : > { %p1602_p1 = pnand %p1600_p2, %p1870_p13 }
  0x2f   : > { %p1603_p6 = pneg %p1602_p1 }
  0x31   : > { %p1608_p3 = pnand %p1606_p10, %p1603_p6 }
  0x33   : > { %1611 = shalt.err (!%p1608_p3)
}
  0x34   : > { %s1612_s28 = scalar_lea.vmem %s1858_s6, 1024  ;;  %p1620_p12 = scmp.lt.s32.totalorder %s1858_s6, %s1858_s6 }
  0x35   : > { %p1613_p5 = scmp.ne.s32.totalorder %s1858_s6, %s1612_s28  ;;  %p1621_p0 = scmp.lt.s32.totalorder %s1612_s28, %s1612_s28 }
  0x37   : > { %p1615_p7 = pnand %p1613_p5, %p1870_p13  ;;  %p1622_p2 = por %p1621_p0, %p1620_p12 }
  0x39   : > { %p1616_p9 = pneg %p1615_p7 }
  0x3b   : > { %p1623_p1 = pnand %p1622_p2, %p1616_p9 }
  0x3d   : > { %1626 = shalt.err (!%p1623_p1)
}
  0x3e   : > { %1437 = dma.hbm_to_vmem [thread:$0]  (!%p1854_p11), %s2219_s2, 1024, %s1858_s6, [#allocation6], %s1764_s23, %s1764_s23, %s1765_s27  }
  0x3f   : > { %s1627_s10 = scalar_lea.hbm %s2220_s3, 2048 }
  0x40   : > { %p1628_p6 = scmp.ne.s32.totalorder %s2220_s3, %s1627_s10  ;;  %p1634_p5 = scmp.lt.u32.totalorder %s1627_s10, %s2220_s3 }
  0x42   : > { %p1630_p10 = pnand %p1628_p6, %p1870_p13 }
  0x44   : > { %p1631_p3 = pneg %p1630_p10 }
  0x46   : > { %p1636_p7 = pnand %p1634_p5, %p1631_p3 }
  0x48   : > { %1639 = shalt.err (!%p1636_p7)
}
  0x49   : > { %s1640_s16 = scalar_lea.vmem %s203_s8, 2048  ;;  %p1648_p2 = scmp.lt.s32.totalorder %s203_s8, %s203_s8 }
  0x4a   : > { %p1641_p9 = scmp.ne.s32.totalorder %s203_s8, %s1640_s16  ;;  %p1649_p1 = scmp.lt.s32.totalorder %s1640_s16, %s1640_s16 }
  0x4c   : > { %p1643_p12 = pnand %p1641_p9, %p1870_p13  ;;  %p1650_p4 = por %p1649_p1, %p1648_p2 }
  0x4e   : > { %p1644_p0 = pneg %p1643_p12 }
  0x50   : > { %p1651_p8 = pnand %p1650_p4, %p1644_p0 }
  0x52   : > { %1654 = shalt.err (!%p1651_p8)
}
  0x53   : > { %s1766_s6 = smov 128   ;;  %s1767_s14 = smov 8  }
  0x54   : > { %1440 = dma.hbm_to_vmem [thread:$0]  (!%p1854_p11), %s2220_s3, 2048, %s203_s8, [#allocation9], %s1766_s6, %s1766_s6, %s1767_s14  }
  0x55   : > { %s1937_s28 = sadd.s32 1, %s1759_s21   ;;  %s30_s30 = sadd.s32 1, %s1755_s20 }
  0x56   : > { %s27_s17 = ssub.s32 %s1759_s21, %s1937_s28  ;;  %p37_p8 = scmp.ne.s32.totalorder %s1755_s20, %s1751_s19 }
  0x57   : > { %p28_p4 = scmp.eq.s32.totalorder %s27_s17, 0  ;;  %p38_p13 = scmp.eq.s32.totalorder %s1759_s21, 0 }
  0x58   : > { %p1452_p6 = scmp.lt.s32.totalorder %s1759_s21, 2  ;;  %p2231_p3 = scmp.eq.s32.totalorder %s1824_s22, 1 }
  0x59   : > { %s1947_s7 = scalar_select %p28_p4, %s1755_s20, %s30_s30  }
  0x5a   : > { %p39_p10 = por %p38_p13, %p37_p8  ;;  %p1951_p5 = por %p2231_p3, %p37_p8 }
  0x5b   : > { %s219_s9 = sand.u32 1, %s1755_s20   ;;  %s1284_s10 = sshll.u32 %s1759_s21, 11 }
  0x5c   : > { %s1208_s8 = sshll.u32 %s219_s9, 7  ;;  %s1960_s13 = scalar_lea.hbm %s2217_s0, %s1284_s10 }
  0x5d   : > { %s223_s15 = scalar_lea.vmem [#allocation2], %s1208_s8  ;;  %p1962_p11 = pnand %p1452_p6, %p39_p10 }
  0x5e   : > { %s231_s16 = sshll.u32 %s223_s15, 4  ;;  %s1968_s27 = scalar_lea.sflag [#allocation3], %s219_s9  ;;  %s1966_s16 = int_to_ptr.vmem [resolvable:$true] %s231_s16 }
  0x5f   : > { %s1655_s17 = scalar_lea.hbm %s1960_s13, 2048  ;;  %p1657_p9 = pneg %p1962_p11 }
  0x60   : > { %p1656_p7 = scmp.ne.s32.totalorder %s1960_s13, %s1655_s17  ;;  %s1660_s8 = scalar_lea.hbm %s2217_s0, 4096 }
  0x61   : > { %p1661_p2 = scmp.lt.u32.totalorder %s1960_s13, %s2217_s0  ;;  %p1662_p1 = scmp.lt.u32.totalorder %s1660_s8, %s1655_s17 }
  0x62   : > { %p1658_p12 = pnand %p1657_p9, %p1656_p7  ;;  %p1664_p8 = scmp.lt.u32.totalorder %s1655_s17, %s1960_s13 }
  0x63   : > { %p1663_p4 = por %p1662_p1, %p1661_p2 }
  0x64   : > { %p1659_p0 = pneg %p1658_p12 }
  0x65   : > { %p1665_p13 = por %p1664_p8, %p1663_p4 }
  0x67   : > { %p1666_p6 = pnand %p1665_p13, %p1659_p0 }
  0x69   : > { %1669 = shalt.err (!%p1666_p6)
}
  0x6a   : > { %s1670_s9 = scalar_lea.vmem %s1966_s16, 2048  ;;  %s1768_s15 = smov [#allocation2]  }
  0x6b   : > { %p1671_p10 = scmp.ne.s32.totalorder %s1966_s16, %s1670_s9  ;;  %s1675_s30 = sshll.u32 %s1768_s15, 4  ;;  %s1676_s30 = int_to_ptr.vmem [resolvable:$false] %s1675_s30 }
  0x6c   : > { %s1677_s10 = scalar_lea.vmem %s1676_s30, 4096  ;;  %p1678_p12 = scmp.lt.s32.totalorder %s1966_s16, %s1676_s30 }
  0x6d   : > { %p1673_p3 = pnand %p1671_p10, %p1657_p9  ;;  %p1679_p2 = scmp.lt.s32.totalorder %s1677_s10, %s1670_s9 }
  0x6f   : > { %p1674_p7 = pneg %p1673_p3  ;;  %p1680_p1 = por %p1679_p2, %p1678_p12 }
  0x71   : > { %p1681_p4 = pnand %p1680_p1, %p1674_p7 }
  0x73   : > { %1684 = shalt.err (!%p1681_p4)
}
  0x74   : > { %1444 = dma.hbm_to_vmem [thread:$0]  (!%p1962_p11), %s1960_s13, 2048, %s1966_s16, %s1968_s27, %s1766_s6, %s1766_s6, %s1767_s14  }
  0x75   : > { %p2234_p9 = scmp.ne.s32.totalorder %s2228_s26, 0 }
  0x76   : > { %s2002_s17 = sand.u32 (!%p2234_p9), 1, %s1751_s19   ;;  %p2235_p0 = scmp.ne.s32.totalorder (!%p2234_p9), %s2226_s24, 0 }
  0x77   : > { %243 = sbr.rel (%p2234_p9) target bundleno = 907 (0x38b), region = 40  ;;  %s1213_s8 = sshll.u32 (!%p2234_p9), %s2002_s17, 7 }
  0x78   : > { %s246_s11 = scalar_lea.sflag (!%p2234_p9), [#allocation3], %s2002_s17  ;;  %s2006_s12 = scalar_lea.vmem (!%p2234_p9), [#allocation2], %s1213_s8 }
  0x7e   : > { %1730 = dma.done.wait (%p2235_p0), %s246_s11, 2048  }
  0x7f   : > { %1732 = vsyncadd (%p2235_p0), %s246_s11, 4294965248  ;;  %p2236_p11 = scmp.eq.s32.totalorder %s1824_s22, 0 }
  0x81   : > { %1734 = dma.done.wait (%p2236_p11), [#allocation6], 3072   ;;  %p2237_p8 = pmov %p2236_p11 }
  0x83   : > { %1736 = vsyncadd (%p2237_p8), [#allocation6], 4294964224  ;;  %p2238_p13 = pmov %p2237_p8 }
  0x84   : > { %p2239_p6 = pmov %p2237_p8 }
  0x85   : > { %1738 = dma.done.wait (%p2238_p13), [#allocation9], 2048  }
  0x86   : > { %1740 = vsyncadd (%p2239_p6), [#allocation9], 4294965248  ;;  %v1499_v0 = vld [vmem:[#allocation5 + $0x40] sm:$0xff]   ;;  %v1501_v2 = vld [vmem:[#allocation5 + $0x48] sm:$0xff]   ;;  %s1217_s23 = sshll.u32 %s2002_s17, 8  ;;  %s1286_s9 = sshll.u32 %s1824_s22, 12 }
  0x87   : > { %v1500_v1 = vld [vmem:[#allocation5] sm:$0xff]   ;;  %1287 = vmatprep.subr.bf16.mxu0 %v1499_v0  ;;  %v1502_v3 = vld [vmem:[#allocation5 + $0x8] sm:$0xff]   ;;  %v1503_v4 = vld [vmem:[#allocation5 + $0x50] sm:$0xff]   ;;  %s2102_s27 = scalar_lea.vmem [#allocation10], %s1217_s23  ;;  %s2167_s8 = scalar_lea.hbm %s2222_s5, %s1286_s9 }
  0x88   : > { %1288 = vmatpush3.bf16.msra.mxu0 %v1500_v1  ;;  %v1504_v5 = vld [vmem:[#allocation5 + $0x10] sm:$0xff]   ;;  %v1505_v6 = vld [vmem:[#allocation5 + $0x58] sm:$0xff]   ;;  %v1507_v8 = vld [vmem:[#allocation5 + $0x60] sm:$0xff]   ;;  %s1100_s15 = sshll.u32 %s2102_s27, 4  ;;  %s1086_s22 = scalar_lea.sflag [#allocation4], %s2002_s17  ;;  %s2169_s15 = int_to_ptr.vmem [resolvable:$true] %s1100_s15 }
  0x89   : > { %1289 = vmatprep.subr.bf16.mxu0 %v1501_v2  ;;  %v1506_v7 = vld [vmem:[#allocation5 + $0x18] sm:$0xff]   ;;  %v1508_v9 = vld [vmem:[#allocation5 + $0x20] sm:$0xff]   ;;  %v1509_v10 = vld [vmem:[#allocation5 + $0x68] sm:$0xff]   ;;  %s1685_s11 = scalar_lea.vmem %s2169_s15, 4096 }
  0x8a   : > { %v1517_v11 = vld [vmem:[%s2006_s12 + $0x4] ss:$8 sps:$4 sm:$0xff]   ;;  %v1511_v13 = vld [vmem:[#allocation5 + $0x70] sm:$0xff]   ;;  %v1513_v15 = vld [vmem:[#allocation5 + $0x78] sm:$0xff]   ;;  %p1686_p10 = scmp.ne.s32.totalorder %s2169_s15, %s1685_s11 }
  0x8b   : > { %v1510_v12 = vld [vmem:[#allocation5 + $0x28] sm:$0xff]   ;;  %555 = vmatprep.mubr.bf16.mxu0 %v1517_v11  ;;  %v1512_v14 = vld [vmem:[#allocation5 + $0x30] sm:$0xff]   ;;  %v1514_v16 = vld [vmem:[#allocation5 + $0x38] sm:$0xff]  }
  0x8c   : > { %1290 = vmatpush3.bf16.msra.mxu0 %v1502_v3  ;;  %v1539_v17 = vld [vmem:[#allocation7] sm:$0xff]   ;;  %v1540_v19 = vld [vmem:[#allocation7 + $0x8] sm:$0xff]   ;;  %v1518_v20 = vld [vmem:[%s2006_s12 + $0x14] ss:$8 sps:$4 sm:$0xff]   ;;  %p1687_p3 = pnand %p1686_p10, %p1951_p5 }
  0x8d   : > { %1291 = vmatprep.subr.bf16.mxu0 %v1503_v4  ;;  %v1515_v18 = vld [vmem:[%s2006_s12] ss:$8 sps:$4 sm:$0xff]   ;;  %1367 = vmatprep.subr.bf16.mxu1 %v1539_v17  ;;  %v1541_v21 = vld [vmem:[#allocation7 + $0x10] sm:$0xff]   ;;  %v1521_v23 = vld [vmem:[%s2006_s12 + $0x24] ss:$8 sps:$4 sm:$0xff]  }
  0x8e   : > { %1368 = vmatpush3.bf16.msra.mxu1 %v1539_v17  ;;  %v1520_v22 = vld [vmem:[%s2006_s12 + $0x10] ss:$8 sps:$4 sm:$0xff]   ;;  %v1523_v24 = vld [vmem:[%s2006_s12 + $0x20] ss:$8 sps:$4 sm:$0xff]   ;;  %v1524_v25 = vld [vmem:[%s2006_s12 + $0x34] ss:$8 sps:$4 sm:$0xff]   ;;  %p1688_p7 = pneg %p1687_p3 }
  0x8f   : > { %1369 = vmatprep.subr.bf16.mxu1 %v1540_v19  ;;  %v1526_v26 = vld [vmem:[%s2006_s12 + $0x30] ss:$8 sps:$4 sm:$0xff]   ;;  %v1527_v27 = vld [vmem:[%s2006_s12 + $0x44] ss:$8 sps:$4 sm:$0xff]   ;;  %v1529_v28 = vld [vmem:[%s2006_s12 + $0x40] ss:$8 sps:$4 sm:$0xff]  }
  0x90   : > { %1292 = vmatpush3.bf16.msra.mxu0 %v1504_v5  ;;  %v1530_v29 = vld [vmem:[%s2006_s12 + $0x54] ss:$8 sps:$4 sm:$0xff]   ;;  %v1532_v30 = vld [vmem:[%s2006_s12 + $0x50] ss:$8 sps:$4 sm:$0xff]   ;;  %v1533_v31 = vld [vmem:[%s2006_s12 + $0x64] ss:$8 sps:$4 sm:$0xff]  }
  0x91   : > { %1293 = vmatprep.subr.bf16.mxu0 %v1505_v6  ;;  %v1535_v32 = vld [vmem:[%s2006_s12 + $0x60] ss:$8 sps:$4 sm:$0xff]   ;;  %v1536_v33 = vld [vmem:[%s2006_s12 + $0x74] ss:$8 sps:$4 sm:$0xff]   ;;  %v1538_v34 = vld [vmem:[%s2006_s12 + $0x70] ss:$8 sps:$4 sm:$0xff]  }
  0x92   : > { %1370 = vmatpush3.bf16.msra.mxu1 %v1540_v19  ;;  %v1542_v35 = vld [vmem:[#allocation7 + $0x18] sm:$0xff]   ;;  %v1543_v36 = vld [vmem:[#allocation7 + $0x20] sm:$0xff]   ;;  %v1544_v37 = vld [vmem:[#allocation7 + $0x28] sm:$0xff]   ;;  %s1770_s12 = smov [#allocation10]  }
  0x93   : > { %1371 = vmatprep.subr.bf16.mxu1 %v1541_v21  ;;  %v1545_v38 = vld [vmem:[#allocation7 + $0x30] sm:$0xff]   ;;  %v1546_v39 = vld [vmem:[#allocation7 + $0x38] sm:$0xff]   ;;  %v1547_v40 = vld [vmem:[#allocation8] ss:$8 sps:$4 sm:$0xff]   ;;  %s1689_s24 = sshll.u32 %s1770_s12, 4  ;;  %s1690_s24 = int_to_ptr.vmem [resolvable:$false] %s1689_s24 }
  0x94   : > { %1294 = vmatpush3.bf16.msra.mxu0 %v1506_v7  ;;  %v1549_v41 = vld [vmem:[#allocation8 + $0x4] ss:$8 sps:$4 sm:$0xff]   ;;  %v1552_v42 = vld [vmem:[#allocation8 + $0x14] ss:$8 sps:$4 sm:$0xff]   ;;  %v1550_v43 = vld [vmem:[#allocation8 + $0x10] ss:$8 sps:$4 sm:$0xff]   ;;  %p1692_p12 = scmp.lt.s32.totalorder %s2169_s15, %s1690_s24 }
  0x95   : > { %1295 = vmatprep.subr.bf16.mxu0 %v1507_v8  ;;  %v1555_v44 = vld [vmem:[#allocation8 + $0x24] ss:$8 sps:$4 sm:$0xff]   ;;  %v1553_v45 = vld [vmem:[#allocation8 + $0x20] ss:$8 sps:$4 sm:$0xff]   ;;  %v2036_v46 = vld [vmem:[#allocation8 + $0x34] ss:$8 sps:$4 sm:$0xff]  }
  0x96   : > { %1372 = vmatpush3.bf16.msra.mxu1 %v1541_v21  ;;  %v2038_v47 = vld [vmem:[#allocation8 + $0x30] ss:$8 sps:$4 sm:$0xff]   ;;  %v2041_v48 = vld [vmem:[#allocation8 + $0x44] ss:$8 sps:$4 sm:$0xff]   ;;  %v2044_v49 = vld [vmem:[#allocation8 + $0x40] ss:$8 sps:$4 sm:$0xff]  }
  0x97   : > { %1373 = vmatprep.subr.bf16.mxu1 %v1542_v35  ;;  %v2047_v50 = vld [vmem:[#allocation8 + $0x54] ss:$8 sps:$4 sm:$0xff]   ;;  %v2050_v51 = vld [vmem:[#allocation8 + $0x50] ss:$8 sps:$4 sm:$0xff]   ;;  %v2057_v54 = vld [vmem:[%s2221_s4] ss:$0 sm:$0xff] }
  0x98   : > { %1296 = vmatpush3.bf16.msra.mxu0 %v1508_v9  ;;  %s1691_s26 = scalar_lea.vmem %s1690_s24, 8192 }
  0x99   : > { %1297 = vmatprep.subr.bf16.mxu0 %v1509_v10  ;;  %p1693_p2 = scmp.lt.s32.totalorder %s1691_s26, %s1685_s11 }
  0x9a   : > { %1374 = vmatpush3.bf16.msra.mxu1 %v1542_v35 }
  0x9b   : > { %1375 = vmatprep.subr.bf16.mxu1 %v1543_v36  ;;  %p1694_p1 = por %p1693_p2, %p1692_p12 }
  0x9c   : > { %1298 = vmatpush3.bf16.msra.mxu0 %v1510_v12 }
  0x9d   : > { %1299 = vmatprep.subr.bf16.mxu0 %v1511_v13  ;;  %p1695_p4 = pnand %p1694_p1, %p1688_p7 }
  0x9e   : > { %1376 = vmatpush3.bf16.msra.mxu1 %v1543_v36 }
  0x9f   : > { %1377 = vmatprep.subr.bf16.mxu1 %v1544_v37 }
  0xa0   : > { %1300 = vmatpush3.bf16.msra.mxu0 %v1512_v14 }
  0xa1   : > { %1301 = vmatprep.subr.bf16.mxu0 %v1513_v15 }
  0xa2   : > { %1378 = vmatpush3.bf16.msra.mxu1 %v1544_v37 }
  0xa3   : > { %1379 = vmatprep.subr.bf16.mxu1 %v1545_v38 }
  0xa4   : > { %1302 = vmatpush3.bf16.msra.mxu0 %v1514_v16 }
  0xa5   : > { %940 = vmatprep.subr.bf16.mxu0 %v1549_v41 }
  0xa6   : > { %1380 = vmatpush3.bf16.msra.mxu1 %v1545_v38 }
  0xa7   : > { %556 = vmatmul.mubr.bf16.vlgmr.msra.gmra.mrb[0].mxu0 %v1515_v18  ;;  %1381 = vmatprep.subr.bf16.mxu1 %v1546_v39 }
  0xa8   : > { %563 = vmatprep.mubr.bf16.mxu0 %v1518_v20  ;;  %941 = vmatpush1.bf16.msra.mxu0 %v1547_v40 }
  0xa9   : > { %942 = vmatprep.subr.bf16.mxu0 %v1552_v42 }
  0xaa   : > { %1382 = vmatpush3.bf16.msra.mxu1 %v1546_v39 }
  0xab   : > { %1399 = vmatprep.subr.bf16.mxu1 %v1549_v41 }
  0xac   : > { %943 = vmatpush1.bf16.msra.mxu0 %v1550_v43 }
  0xad   : > { %944 = vmatprep.subr.bf16.mxu0 %v1555_v44 }
  0xaf   : > { %564 = vmatmul.mubr.bf16.gmra.mrb[4].mxu0 %v1520_v22 }
  0xb0   : > { %571 = vmatprep.mubr.bf16.mxu0 %v1521_v23  ;;  %945 = vmatpush1.bf16.msra.mxu0 %v1553_v45 }
  0xb1   : > { %946 = vmatprep.subr.bf16.mxu0 %v2036_v46 }
  0xb4   : > { %947 = vmatpush1.bf16.msra.mxu0 %v2038_v47 }
  0xb5   : > { %948 = vmatprep.subr.bf16.mxu0 %v2041_v48 }
  0xb7   : > { %572 = vmatmul.mubr.bf16.gmra.mrb[8].mxu0 %v1523_v24 }
  0xb8   : > { %579 = vmatprep.mubr.bf16.mxu0 %v1524_v25  ;;  %949 = vmatpush1.bf16.msra.mxu0 %v2044_v49 }
  0xb9   : > { %950 = vmatprep.subr.bf16.mxu0 %v2047_v50 }
  0xbc   : > { %951 = vmatpush1.bf16.msra.mxu0 %v2050_v51 }
  0xbf   : > { %580 = vmatmul.mubr.bf16.gmra.mrb[12].mxu0 %v1526_v26 }
  0xc0   : > { %587 = vmatprep.mubr.bf16.mxu0 %v1527_v27 }
  0xc7   : > { %588 = vmatmul.mubr.bf16.gmra.mrb[16].mxu0 %v1529_v28 }
  0xc8   : > { %595 = vmatprep.mubr.bf16.mxu0 %v1530_v29 }
  0xcf   : > { %596 = vmatmul.mubr.bf16.gmra.mrb[20].mxu0 %v1532_v30 }
  0xd0   : > { %603 = vmatprep.mubr.bf16.mxu0 %v1533_v31 }
  0xd7   : > { %604 = vmatmul.mubr.bf16.gmra.mrb[24].mxu0 %v1535_v32 }
  0xd8   : > { %611 = vmatprep.mubr.bf16.mxu0 %v1536_v33 }
  0xdf   : > { %612 = vmatmul.mubr.bf16.gmra.mrb[28].mxu0 %v1538_v34 }
 0x17a   : > { %v1303_v52 = vpop.f32.mrb[0].mxu0 }
 0x17b   : > { %v1304_v53 = vpop.f32.mrb[1].mxu0 }
 0x17c   : > { %v1305_v55 = vadd.f32 %v1304_v53, %v1303_v52  ;;  %v1306_v56 = vpop.f32.mrb[2].mxu0 }
 0x17d   : > { %v1307_v57 = vpop.f32.mrb[3].mxu0 }
 0x17e   : > { %v1308_v58 = vadd.f32 %v1307_v57, %v1306_v56  ;;  %v558_v59 = vadd.f32 %v1305_v55, %v2057_v54 }
 0x180   : > { %v561_v60 = vadd.f32 %v1308_v58, %v2057_v54  ;;  %v620_v62 = vmax.f32 %v558_v59, 0.0 }
 0x182   : > { %v1309_v61 = vpop.f32.mrb[4].mxu0  ;;  %v621_v63 = vmax.f32 %v561_v60, 0.0 }
 0x183   : > { %v1310_v0 = vpop.f32.mrb[5].mxu0 }
 0x184   : > { %v1311_v1 = vadd.f32 %v1310_v0, %v1309_v61  ;;  %v1312_v2 = vpop.f32.mrb[6].mxu0  ;;  %v636_v3 = vpack.c.bf16 %v621_v63, %v620_v62 }
 0x185   : > { %v1313_v4 = vpop.f32.mrb[7].mxu0 }
 0x186   : > { %v566_v5 = vadd.f32 %v1311_v1, %v2057_v54  ;;  %v1314_v6 = vadd.f32 %v1313_v4, %v1312_v2  ;;  %1383 = vmatprep.mubr.bf16.mxu1 %v636_v3 }
 0x188   : > { %v569_v7 = vadd.f32 %v1314_v6, %v2057_v54  ;;  %v622_v8 = vmax.f32 %v566_v5, 0.0 }
 0x18a   : > { %v623_v9 = vmax.f32 %v569_v7, 0.0  ;;  %v1315_v10 = vpop.f32.mrb[8].mxu0 }
 0x18b   : > { %v1316_v11 = vpop.f32.mrb[9].mxu0 }
 0x18c   : > { %v1317_v12 = vadd.f32 %v1316_v11, %v1315_v10  ;;  %v1318_v13 = vpop.f32.mrb[10].mxu0  ;;  %v637_v14 = vpack.c.bf16 %v623_v9, %v622_v8 }
 0x18d   : > { %v1319_v15 = vpop.f32.mrb[11].mxu0 }
 0x18e   : > { %v574_v16 = vadd.f32 %v1317_v12, %v2057_v54  ;;  %v1320_v17 = vadd.f32 %v1319_v15, %v1318_v13  ;;  %1384 = vmatmul.mubr.bf16.vlgmr.msra.gmra.mrb[0].mxu1 %v637_v14  ;;  %v1567_v14 = vld [vmem:[#allocation8 + $0x64] ss:$8 sps:$4 sm:$0xff]   ;;  %v1565_v15 = vld [vmem:[#allocation8 + $0x60] ss:$8 sps:$4 sm:$0xff]  }
 0x18f   : > { %1407 = vmatpush1.bf16.msra.mxu1 %v1547_v40  ;;  %952 = vmatprep.subr.bf16.mxu0 %v1567_v14 }
 0x190   : > { %v577_v18 = vadd.f32 %v1320_v17, %v2057_v54  ;;  %1400 = vmatprep.subr.bf16.mxu1 %v1552_v42  ;;  %v624_v19 = vmax.f32 %v574_v16, 0.0  ;;  %953 = vmatpush1.bf16.msra.mxu0 %v1565_v15  ;;  %v1570_v16 = vld [vmem:[#allocation8 + $0x74] ss:$8 sps:$4 sm:$0xff]   ;;  %v1568_v17 = vld [vmem:[#allocation8 + $0x70] ss:$8 sps:$4 sm:$0xff]  }
 0x191   : > { %954 = vmatprep.subr.bf16.mxu0 %v1570_v16 }
 0x192   : > { %v625_v20 = vmax.f32 %v577_v18, 0.0  ;;  %v1321_v21 = vpop.f32.mrb[12].mxu0  ;;  %v1769_v18 = vmov 0  }
 0x193   : > { %v1322_v22 = vpop.f32.mrb[13].mxu0  ;;  %1408 = vmatpush1.bf16.msra.mxu1 %v1550_v43  ;;  %972 = vmatprep.mubr.bf16.mxu0 %v1769_v18 }
 0x194   : > { %v1323_v23 = vadd.f32 %v1322_v22, %v1321_v21  ;;  %v1324_v24 = vpop.f32.mrb[14].mxu0  ;;  %v638_v25 = vpack.c.bf16 %v625_v20, %v624_v19  ;;  %1401 = vmatprep.subr.bf16.mxu1 %v1555_v44  ;;  %955 = vmatpush1.bf16.msra.mxu0 %v1568_v17 }
 0x195   : > { %v1325_v26 = vpop.f32.mrb[15].mxu0 }
 0x196   : > { %v582_v27 = vadd.f32 %v1323_v23, %v2057_v54  ;;  %v1326_v28 = vadd.f32 %v1325_v26, %v1324_v24  ;;  %1387 = vmatprep.mubr.bf16.mxu1 %v638_v25 }
 0x197   : > { %1409 = vmatpush1.bf16.msra.mxu1 %v1553_v45 }
 0x198   : > { %v585_v29 = vadd.f32 %v1326_v28, %v2057_v54  ;;  %1402 = vmatprep.subr.bf16.mxu1 %v2036_v46  ;;  %v626_v30 = vmax.f32 %v582_v27, 0.0 }
 0x19a   : > { %v627_v31 = vmax.f32 %v585_v29, 0.0  ;;  %v1327_v32 = vpop.f32.mrb[16].mxu0 }
 0x19b   : > { %v1328_v33 = vpop.f32.mrb[17].mxu0  ;;  %1410 = vmatpush1.bf16.msra.mxu1 %v2038_v47 }
 0x19c   : > { %v1329_v34 = vadd.f32 %v1328_v33, %v1327_v32  ;;  %v1330_v35 = vpop.f32.mrb[18].mxu0  ;;  %v639_v36 = vpack.c.bf16 %v627_v31, %v626_v30  ;;  %1403 = vmatprep.subr.bf16.mxu1 %v2041_v48 }
 0x19d   : > { %v1331_v37 = vpop.f32.mrb[19].mxu0 }
 0x19e   : > { %v590_v38 = vadd.f32 %v1329_v34, %v2057_v54  ;;  %v1332_v39 = vadd.f32 %v1331_v37, %v1330_v35  ;;  %1388 = vmatmul.mubr.bf16.gmra.mrb[4].mxu1 %v639_v36 }
 0x19f   : > { %1411 = vmatpush1.bf16.msra.mxu1 %v2044_v49 }
 0x1a0   : > { %v593_v40 = vadd.f32 %v1332_v39, %v2057_v54  ;;  %1404 = vmatprep.subr.bf16.mxu1 %v2047_v50  ;;  %v628_v41 = vmax.f32 %v590_v38, 0.0 }
 0x1a2   : > { %v629_v42 = vmax.f32 %v593_v40, 0.0  ;;  %v1333_v43 = vpop.f32.mrb[20].mxu0 }
 0x1a3   : > { %v1334_v44 = vpop.f32.mrb[21].mxu0  ;;  %1412 = vmatpush1.bf16.msra.mxu1 %v2050_v51 }
 0x1a4   : > { %v1335_v45 = vadd.f32 %v1334_v44, %v1333_v43  ;;  %v1336_v46 = vpop.f32.mrb[22].mxu0  ;;  %v640_v47 = vpack.c.bf16 %v629_v42, %v628_v41  ;;  %1405 = vmatprep.subr.bf16.mxu1 %v1567_v14 }
 0x1a5   : > { %v1337_v48 = vpop.f32.mrb[23].mxu0 }
 0x1a6   : > { %v598_v52 = vadd.f32 %v1335_v45, %v2057_v54  ;;  %v1338_v53 = vadd.f32 %v1337_v48, %v1336_v46  ;;  %1391 = vmatprep.mubr.bf16.mxu1 %v640_v47 }
 0x1a7   : > { %1413 = vmatpush1.bf16.msra.mxu1 %v1565_v15  ;;  %v1218_v15 = vld [vmem:[%s2221_s4 + $0x2] ss:$4 sm:$0x3] }
 0x1a8   : > { %v601_v49 = vadd.f32 %v1338_v53, %v2057_v54  ;;  %v630_v55 = vmax.f32 %v598_v52, 0.0  ;;  %1406 = vmatprep.subr.bf16.mxu1 %v1570_v16 }
 0x1aa   : > { %v631_v56 = vmax.f32 %v601_v49, 0.0  ;;  %v1339_v57 = vpop.f32.mrb[24].mxu0 }
 0x1ab   : > { %v1340_v50 = vpop.f32.mrb[25].mxu0  ;;  %1414 = vmatpush1.bf16.msra.mxu1 %v1568_v17 }
 0x1ac   : > { %v1341_v58 = vadd.f32 %v1340_v50, %v1339_v57  ;;  %v1342_v59 = vpop.f32.mrb[26].mxu0  ;;  %v641_v60 = vpack.c.bf16 %v631_v56, %v630_v55 }
 0x1ad   : > { %v1343_v61 = vpop.f32.mrb[27].mxu0 }
 0x1ae   : > { %v606_v51 = vadd.f32 %v1341_v58, %v2057_v54  ;;  %v1344_v62 = vadd.f32 %v1343_v61, %v1342_v59  ;;  %1392 = vmatmul.mubr.bf16.gmra.mrb[8].mxu1 %v641_v60 }
 0x1b0   : > { %v609_v63 = vadd.f32 %v1344_v62, %v2057_v54  ;;  %v632_v0 = vmax.f32 %v606_v51, 0.0 }
 0x1b2   : > { %v633_v1 = vmax.f32 %v609_v63, 0.0  ;;  %v1345_v2 = vpop.f32.mrb[28].mxu0 }
 0x1b3   : > { %v1346_v3 = vpop.f32.mrb[29].mxu0 }
 0x1b4   : > { %v1347_v4 = vadd.f32 %v1346_v3, %v1345_v2  ;;  %v1348_v5 = vpop.f32.mrb[30].mxu0  ;;  %v642_v6 = vpack.c.bf16 %v633_v1, %v632_v0 }
 0x1b5   : > { %v1349_v7 = vpop.f32.mrb[31].mxu0 }
 0x1b6   : > { %v614_v8 = vadd.f32 %v1347_v4, %v2057_v54  ;;  %v1350_v9 = vadd.f32 %v1349_v7, %v1348_v5  ;;  %1395 = vmatprep.mubr.bf16.mxu1 %v642_v6 }
 0x1b8   : > { %v617_v10 = vadd.f32 %v1350_v9, %v2057_v54  ;;  %v634_v11 = vmax.f32 %v614_v8, 0.0  ;;  %v1252_v54 = vld [vmem:[%s2221_s4 + $0x1] ss:$0 sm:$0xff] }
 0x1ba   : > { %v635_v12 = vmax.f32 %v617_v10, 0.0 }
 0x1bc   : > { %v643_v13 = vpack.c.bf16 %v635_v12, %v634_v11  ;;  %v850_v12 = vlaneseq }
 0x1be   : > { %1396 = vmatmul.mubr.bf16.gmra.mrb[12].mxu1 %v643_v13  ;;  %v851_v13 = vshrl.u32 %v850_v12, 7 }
 0x1bf   : > { %992 = vmatprep.mubr.bf16.mxu1 %v1769_v18 }
 0x1c0   : > { %v852_v14 = vsub.s32 0, %v851_v13  ;;  %v856_v16 = vsub.s32 1, %v851_v13 }
 0x1c2   : > { %v2096_v17 = vrot.slane %v1218_v15, %v852_v14 }
 0x261   : > { %v1385_v19 = vpop.f32.mrb[0].mxu1 }
 0x262   : > { %v755_v20 = vadd.f32 %v1385_v19, %v1252_v54  ;;  %v746_v21 = vpop.f32.mrb[1].mxu1 }
 0x263   : > { %v747_v22 = vadd.f32 %v1252_v54, %v746_v21  ;;  %v1386_v23 = vpop.f32.mrb[2].mxu1 }
 0x264   : > { %v758_v24 = vadd.f32 %v1386_v23, %v1252_v54  ;;  %v749_v25 = vpop.f32.mrb[3].mxu1  ;;  %v811_v27 = vmax.f32 %v755_v20, 0.0 }
 0x265   : > { %v750_v26 = vadd.f32 %v1252_v54, %v749_v25  ;;  %v809_v29 = vmax.f32 %v747_v22, 0.0 }
 0x266   : > { %v812_v28 = vmax.f32 %v758_v24, 0.0 }
 0x267   : > { %v810_v30 = vmax.f32 %v750_v26, 0.0 }
 0x268   : > { %v826_v31 = vpack.c.bf16 %v812_v28, %v811_v27 }
 0x269   : > { %v825_v32 = vpack.c.bf16 %v810_v30, %v809_v29 }
 0x26b   : > { %973 = vmatmul.mubr.bf16.vlgmr.msra.gmra.mrb[32].mxu0 %v825_v32 }
 0x26c   : > { %982 = vmatprep.mubr.bf16.mxu0 %v1769_v18 }
 0x271   : > { %v1389_v33 = vpop.f32.mrb[4].mxu1 }
 0x272   : > { %v771_v34 = vadd.f32 %v1389_v33, %v1252_v54  ;;  %v762_v35 = vpop.f32.mrb[5].mxu1 }
 0x273   : > { %v763_v36 = vadd.f32 %v1252_v54, %v762_v35  ;;  %v1390_v37 = vpop.f32.mrb[6].mxu1  ;;  %983 = vmatmul.mubr.bf16.gmra.mrb[36].mxu0 %v826_v31 }
 0x274   : > { %v774_v38 = vadd.f32 %v1390_v37, %v1252_v54  ;;  %v765_v39 = vpop.f32.mrb[7].mxu1  ;;  %v815_v41 = vmax.f32 %v771_v34, 0.0 }
 0x275   : > { %v766_v40 = vadd.f32 %v1252_v54, %v765_v39  ;;  %v813_v43 = vmax.f32 %v763_v36, 0.0 }
 0x276   : > { %v816_v42 = vmax.f32 %v774_v38, 0.0 }
 0x277   : > { %v814_v44 = vmax.f32 %v766_v40, 0.0 }
 0x278   : > { %v828_v45 = vpack.c.bf16 %v816_v42, %v815_v41 }
 0x279   : > { %v827_v46 = vpack.c.bf16 %v814_v44, %v813_v43 }
 0x27b   : > { %993 = vmatmul.mubr.bf16.vlgmr.msra.gmra.mrb[16].mxu1 %v827_v46 }
 0x27c   : > { %1002 = vmatprep.mubr.bf16.mxu1 %v1769_v18 }
 0x281   : > { %v1393_v47 = vpop.f32.mrb[8].mxu1 }
 0x282   : > { %v787_v48 = vadd.f32 %v1393_v47, %v1252_v54  ;;  %v778_v52 = vpop.f32.mrb[9].mxu1 }
 0x283   : > { %v779_v53 = vadd.f32 %v1252_v54, %v778_v52  ;;  %v1394_v49 = vpop.f32.mrb[10].mxu1  ;;  %1003 = vmatmul.mubr.bf16.gmra.mrb[20].mxu1 %v828_v45 }
 0x284   : > { %v790_v55 = vadd.f32 %v1394_v49, %v1252_v54  ;;  %v781_v56 = vpop.f32.mrb[11].mxu1  ;;  %1012 = vmatprep.mubr.bf16.mxu1 %v1769_v18  ;;  %v819_v50 = vmax.f32 %v787_v48, 0.0 }
 0x285   : > { %v782_v57 = vadd.f32 %v1252_v54, %v781_v56  ;;  %v817_v59 = vmax.f32 %v779_v53, 0.0 }
 0x286   : > { %v820_v58 = vmax.f32 %v790_v55, 0.0 }
 0x287   : > { %v818_v60 = vmax.f32 %v782_v57, 0.0 }
 0x288   : > { %v830_v61 = vpack.c.bf16 %v820_v58, %v819_v50 }
 0x289   : > { %v829_v51 = vpack.c.bf16 %v818_v60, %v817_v59 }
 0x28b   : > { %1013 = vmatmul.mubr.bf16.gmra.mrb[24].mxu1 %v829_v51 }
 0x28c   : > { %1022 = vmatprep.mubr.bf16.mxu1 %v1769_v18 }
 0x291   : > { %v1397_v62 = vpop.f32.mrb[12].mxu1 }
 0x292   : > { %v803_v63 = vadd.f32 %v1397_v62, %v1252_v54  ;;  %v794_v0 = vpop.f32.mrb[13].mxu1 }
 0x293   : > { %v795_v1 = vadd.f32 %v1252_v54, %v794_v0  ;;  %v1398_v2 = vpop.f32.mrb[14].mxu1  ;;  %1023 = vmatmul.mubr.bf16.gmra.mrb[28].mxu1 %v830_v61 }
 0x294   : > { %v806_v3 = vadd.f32 %v1398_v2, %v1252_v54  ;;  %v797_v4 = vpop.f32.mrb[15].mxu1  ;;  %1032 = vmatprep.mubr.bf16.mxu1 %v1769_v18  ;;  %v823_v6 = vmax.f32 %v803_v63, 0.0 }
 0x295   : > { %v798_v5 = vadd.f32 %v1252_v54, %v797_v4  ;;  %v821_v8 = vmax.f32 %v795_v1, 0.0  ;;  %v2098_v54 = vrot.slane %v1218_v15, %v856_v16 }
 0x296   : > { %v824_v7 = vmax.f32 %v806_v3, 0.0 }
 0x297   : > { %v822_v9 = vmax.f32 %v798_v5, 0.0 }
 0x298   : > { %v832_v10 = vpack.c.bf16 %v824_v7, %v823_v6 }
 0x299   : > { %v831_v11 = vpack.c.bf16 %v822_v9, %v821_v8 }
 0x29b   : > { %1033 = vmatmul.mubr.bf16.gmra.mrb[32].mxu1 %v831_v11 }
 0x29c   : > { %1042 = vmatprep.mubr.bf16.mxu1 %v1769_v18 }
 0x2a3   : > { %1043 = vmatmul.mubr.bf16.gmra.mrb[36].mxu1 %v832_v10 }
 0x33e   : > { %v974_v19 = vpop.f32.mrb[32].mxu0 }
 0x33f   : > { %v975_v20 = vadd.f32 %v974_v19, %v2096_v17  ;;  %v976_v21 = vpop.f32.mrb[33].mxu0 }
 0x340   : > { %v977_v18 = vadd.f32 %v976_v21, %v2098_v54  ;;  %v978_v22 = vpop.f32.mrb[34].mxu0 }
 0x341   : > { %1053 = vst [vmem:[%s2102_s27] sm:$0xff] %v975_v20  ;;  %v979_v23 = vadd.f32 %v978_v22, %v2096_v17  ;;  %v980_v24 = vpop.f32.mrb[35].mxu0 }
 0x342   : > { %1054 = vst [vmem:[%s2102_s27 + $0x8] sm:$0xff] %v977_v18  ;;  %v981_v25 = vadd.f32 %v980_v24, %v2098_v54 }
 0x343   : > { %1055 = vst [vmem:[%s2102_s27 + $0x10] sm:$0xff] %v979_v23 }
 0x344   : > { %1056 = vst [vmem:[%s2102_s27 + $0x18] sm:$0xff] %v981_v25 }
 0x346   : > { %v984_v26 = vpop.f32.mrb[36].mxu0 }
 0x347   : > { %v985_v27 = vadd.f32 %v984_v26, %v2096_v17  ;;  %v986_v28 = vpop.f32.mrb[37].mxu0 }
 0x348   : > { %v987_v29 = vadd.f32 %v986_v28, %v2098_v54  ;;  %v988_v30 = vpop.f32.mrb[38].mxu0 }
 0x349   : > { %1057 = vst [vmem:[%s2102_s27 + $0x20] sm:$0xff] %v985_v27  ;;  %v989_v31 = vadd.f32 %v988_v30, %v2096_v17  ;;  %v990_v32 = vpop.f32.mrb[39].mxu0 }
 0x34a   : > { %1058 = vst [vmem:[%s2102_s27 + $0x28] sm:$0xff] %v987_v29  ;;  %v991_v33 = vadd.f32 %v990_v32, %v2098_v54 }
 0x34b   : > { %1059 = vst [vmem:[%s2102_s27 + $0x30] sm:$0xff] %v989_v31 }
 0x34c   : > { %1060 = vst [vmem:[%s2102_s27 + $0x38] sm:$0xff] %v991_v33 }
 0x34e   : > { %v994_v34 = vpop.f32.mrb[16].mxu1 }
 0x34f   : > { %v995_v35 = vadd.f32 %v994_v34, %v2096_v17  ;;  %v996_v36 = vpop.f32.mrb[17].mxu1 }
 0x350   : > { %v997_v37 = vadd.f32 %v996_v36, %v2098_v54  ;;  %v998_v38 = vpop.f32.mrb[18].mxu1 }
 0x351   : > { %1061 = vst [vmem:[%s2102_s27 + $0x40] sm:$0xff] %v995_v35  ;;  %v999_v39 = vadd.f32 %v998_v38, %v2096_v17  ;;  %v1000_v40 = vpop.f32.mrb[19].mxu1 }
 0x352   : > { %1062 = vst [vmem:[%s2102_s27 + $0x48] sm:$0xff] %v997_v37  ;;  %v1001_v41 = vadd.f32 %v1000_v40, %v2098_v54 }
 0x353   : > { %1063 = vst [vmem:[%s2102_s27 + $0x50] sm:$0xff] %v999_v39 }
 0x354   : > { %1064 = vst [vmem:[%s2102_s27 + $0x58] sm:$0xff] %v1001_v41 }
 0x356   : > { %v1004_v42 = vpop.f32.mrb[20].mxu1 }
 0x357   : > { %v1005_v43 = vadd.f32 %v1004_v42, %v2096_v17  ;;  %v1006_v44 = vpop.f32.mrb[21].mxu1 }
 0x358   : > { %v1007_v45 = vadd.f32 %v1006_v44, %v2098_v54  ;;  %v1008_v46 = vpop.f32.mrb[22].mxu1 }
 0x359   : > { %1065 = vst [vmem:[%s2102_s27 + $0x60] sm:$0xff] %v1005_v43  ;;  %v1009_v47 = vadd.f32 %v1008_v46, %v2096_v17  ;;  %v1010_v48 = vpop.f32.mrb[23].mxu1 }
 0x35a   : > { %1066 = vst [vmem:[%s2102_s27 + $0x68] sm:$0xff] %v1007_v45  ;;  %v1011_v52 = vadd.f32 %v1010_v48, %v2098_v54 }
 0x35b   : > { %1067 = vst [vmem:[%s2102_s27 + $0x70] sm:$0xff] %v1009_v47 }
 0x35c   : > { %1068 = vst [vmem:[%s2102_s27 + $0x78] sm:$0xff] %v1011_v52 }
 0x35e   : > { %v1014_v53 = vpop.f32.mrb[24].mxu1 }
 0x35f   : > { %v1015_v49 = vadd.f32 %v1014_v53, %v2096_v17  ;;  %v1016_v55 = vpop.f32.mrb[25].mxu1 }
 0x360   : > { %v1017_v56 = vadd.f32 %v1016_v55, %v2098_v54  ;;  %v1018_v57 = vpop.f32.mrb[26].mxu1 }
 0x361   : > { %1069 = vst [vmem:[%s2102_s27 + $0x80] sm:$0xff] %v1015_v49  ;;  %v1019_v50 = vadd.f32 %v1018_v57, %v2096_v17  ;;  %v1020_v58 = vpop.f32.mrb[27].mxu1 }
 0x362   : > { %1070 = vst [vmem:[%s2102_s27 + $0x88] sm:$0xff] %v1017_v56  ;;  %v1021_v59 = vadd.f32 %v1020_v58, %v2098_v54 }
 0x363   : > { %1071 = vst [vmem:[%s2102_s27 + $0x90] sm:$0xff] %v1019_v50 }
 0x364   : > { %1072 = vst [vmem:[%s2102_s27 + $0x98] sm:$0xff] %v1021_v59 }
 0x366   : > { %v1024_v60 = vpop.f32.mrb[28].mxu1 }
 0x367   : > { %v1025_v61 = vadd.f32 %v1024_v60, %v2096_v17  ;;  %v1026_v51 = vpop.f32.mrb[29].mxu1 }
 0x368   : > { %v1027_v62 = vadd.f32 %v1026_v51, %v2098_v54  ;;  %v1028_v63 = vpop.f32.mrb[30].mxu1 }
 0x369   : > { %1073 = vst [vmem:[%s2102_s27 + $0xa0] sm:$0xff] %v1025_v61  ;;  %v1029_v0 = vadd.f32 %v1028_v63, %v2096_v17  ;;  %v1030_v1 = vpop.f32.mrb[31].mxu1 }
 0x36a   : > { %1074 = vst [vmem:[%s2102_s27 + $0xa8] sm:$0xff] %v1027_v62  ;;  %v1031_v2 = vadd.f32 %v1030_v1, %v2098_v54 }
 0x36b   : > { %1075 = vst [vmem:[%s2102_s27 + $0xb0] sm:$0xff] %v1029_v0 }
 0x36c   : > { %1076 = vst [vmem:[%s2102_s27 + $0xb8] sm:$0xff] %v1031_v2 }
 0x36e   : > { %v1034_v3 = vpop.f32.mrb[32].mxu1 }
 0x36f   : > { %v1035_v4 = vadd.f32 %v1034_v3, %v2096_v17  ;;  %v1036_v5 = vpop.f32.mrb[33].mxu1 }
 0x370   : > { %v1037_v6 = vadd.f32 %v1036_v5, %v2098_v54  ;;  %v1038_v7 = vpop.f32.mrb[34].mxu1 }
 0x371   : > { %1077 = vst [vmem:[%s2102_s27 + $0xc0] sm:$0xff] %v1035_v4  ;;  %v1039_v8 = vadd.f32 %v1038_v7, %v2096_v17  ;;  %v1040_v9 = vpop.f32.mrb[35].mxu1 }
 0x372   : > { %1078 = vst [vmem:[%s2102_s27 + $0xc8] sm:$0xff] %v1037_v6  ;;  %v1041_v10 = vadd.f32 %v1040_v9, %v2098_v54 }
 0x373   : > { %1079 = vst [vmem:[%s2102_s27 + $0xd0] sm:$0xff] %v1039_v8 }
 0x374   : > { %1080 = vst [vmem:[%s2102_s27 + $0xd8] sm:$0xff] %v1041_v10 }
 0x376   : > { %v1044_v11 = vpop.f32.mrb[36].mxu1 }
 0x377   : > { %v1045_v12 = vadd.f32 %v1044_v11, %v2096_v17  ;;  %v1046_v13 = vpop.f32.mrb[37].mxu1 }
 0x378   : > { %v1047_v14 = vadd.f32 %v1046_v13, %v2098_v54  ;;  %v1048_v15 = vpop.f32.mrb[38].mxu1 }
 0x379   : > { %1081 = vst [vmem:[%s2102_s27 + $0xe0] sm:$0xff] %v1045_v12  ;;  %v1049_v16 = vadd.f32 %v1048_v15, %v2096_v17  ;;  %v1050_v19 = vpop.f32.mrb[39].mxu1 }
 0x37a   : > { %1082 = vst [vmem:[%s2102_s27 + $0xe8] sm:$0xff] %v1047_v14  ;;  %v1051_v20 = vadd.f32 %v1050_v19, %v2098_v54 }
 0x37b   : > { %1083 = vst [vmem:[%s2102_s27 + $0xf0] sm:$0xff] %v1049_v16 }
 0x37c   : > { %1084 = vst [vmem:[%s2102_s27 + $0xf8] sm:$0xff] %v1051_v20 }
 0x37d   : > { %1698 = shalt.err (!%p1695_p4)
}
 0x37e   : > { %s1699_s6 = scalar_lea.hbm %s2167_s8, 4096  ;;  %s1703_s16 = scalar_lea.hbm %s2222_s5, 8192 }
 0x37f   : > { %p1700_p9 = scmp.ne.s32.totalorder %s2167_s8, %s1699_s6  ;;  %p1704_p8 = scmp.lt.u32.totalorder %s2167_s8, %s2222_s5 }
 0x380   : > { %p1705_p13 = scmp.lt.u32.totalorder %s1703_s16, %s1699_s6  ;;  %p1707_p10 = scmp.lt.u32.totalorder %s1699_s6, %s2167_s8 }
 0x381   : > { %p1701_p0 = pnand %p1700_p9, %p1951_p5 }
 0x382   : > { %p1706_p6 = por %p1705_p13, %p1704_p8 }
 0x383   : > { %p1702_p11 = pneg %p1701_p0 }
 0x384   : > { %p1708_p3 = por %p1707_p10, %p1706_p6 }
 0x386   : > { %p1709_p7 = pnand %p1708_p3, %p1702_p11 }
 0x388   : > { %1712 = shalt.err (!%p1709_p7)
}
 0x389   : > { %s1771_s9 = smov 256   ;;  %s1772_s30 = smov 16  }
 0x38a   : > { %1429 = dma.vmem_to_hbm [thread:$0]  (%p1951_p5), %s2169_s15, 4096, %s2167_s8, %s1086_s22, %s1771_s9, %s1771_s9, %s1772_s30  }
 0x38b PF: > { %s1115_s10 = sand.u32 1, %s1747_s18   ;;  %p2240_p12 = scmp.ne.s32.totalorder %s2227_s25, 0 }
 0x38c   : > { %p2241_p2 = scmp.ge.s32.totalorder %s1759_s21, 2  ;;  %s1116_s11 = scalar_lea.sflag [#allocation4], %s1115_s10 }
 0x38e   : > { %p1446_p1 = pnand %p2241_p2, %p2240_p12 }
 0x390   : > { %1742 = dma.done.wait (!%p1446_p1), %s1116_s11, 4096  }
 0x391   : > { %1744 = vsyncadd (!%p1446_p1), %s1116_s11, 4294963200  ;;  %p20_p4 = scmp.ge.s32.totalorder %s1937_s28, 4   ;;  %s2242_s18 = smov %s1751_s19 }
 0x392   : > { %s2243_s19 = smov %s1755_s20  ;;  %s2244_s20 = smov %s1947_s7 }
 0x393   : > { %s2245_s21 = smov %s1937_s28  ;;  %22 = sbr.rel (!%p20_p4) target bundleno = 7 (0x7), region = 98 }
 0x39a   :  { %1121 = vsyncpa [#allocation3], 1 }
 0x39b   :  { %1123 = vsyncpa [#allocation3 + $0x1], 1 }
 0x39c   :  { %1124 = vsyncpa [#allocation6], 1 }
 0x39d   :  { %1125 = vsyncpa [#allocation9], 1 }
 0x39e   :  { %1126 = vsyncpa [#allocation4], 1 }
 0x39f   :  { %1128 = vsyncpa [#allocation4 + $0x1], 1 }

</bundles_post_ra>
